<compile_context>
chip_gen: v6e
topology: v6e:2x2x1
jax: 0.10.0
libtpu: 0.0.40
codegen_flags: <defaults>
</compile_context>

<pallas_src>
import jax
import jax.numpy as jnp
from jax.experimental import pallas as pl
from jax.experimental.pallas import tpu as pltpu


def text_encoder_kernel(x_ref, w_ref, b_ref, o_ref):
    # x_ref: [B, Kp] bf16, w_ref: [Kp, TN] bf16, b_ref: [1, TN] f32,
    # o_ref: [B, TN] f32.  out = relu(x @ W + b), accumulated in f32.
    y = jnp.dot(x_ref[...], w_ref[...], preferred_element_type=jnp.float32)
    y = y + b_ref[...]                       # bias broadcast over batch rows
    o_ref[...] = jnp.maximum(y, 0.0).astype(o_ref.dtype)


def text_encoder_forward(x, w_t, b, *, tn=512):
    """x: [B, 300] f32, w_t: [300, E] f32, b: [1, E] f32 -> relu(x @ w_t + b), [B, E] f32."""
    B, K = x.shape
    Kw, E = w_t.shape
    assert K == Kw and b.shape == (1, E)

    # Lane-dense padding: K 300->384, E 1000->1024 (tn must divide E_pad).
    K_pad = int(pl.cdiv(K, 128)) * 128
    E_pad = int(pl.cdiv(E, tn)) * tn
    n_tiles = E_pad // tn

    # bf16 inputs/weights (halves HBM traffic); bias stays f32 for accuracy.
    x_p = jnp.zeros((B, K_pad), jnp.bfloat16).at[:, :K].set(x.astype(jnp.bfloat16))
    w_p = jnp.zeros((K_pad, E_pad), jnp.bfloat16).at[:K, :E].set(
        w_t.astype(jnp.bfloat16))
    b_p = jnp.zeros((1, E_pad), jnp.float32).at[:, :E].set(b.astype(jnp.float32))

    bytes_accessed = (x_p.size * 2) + (w_p.size * 2) + (b_p.size * 4) + (B * E_pad * 4)
    cost = pl.CostEstimate(flops=2 * B * K_pad * E_pad,
                           transcendentals=0,
                           bytes_accessed=bytes_accessed)

    out_padded = pl.pallas_call(
        text_encoder_kernel,
        out_shape=jax.ShapeDtypeStruct((B, E_pad), jnp.float32),
        grid_spec=pltpu.PrefetchScalarGridSpec(
            num_scalar_prefetch=0,
            grid=(n_tiles,),
            in_specs=[
                pl.BlockSpec((B, K_pad), lambda i: (0, 0)),   # x resident across tiles
                pl.BlockSpec((K_pad, tn), lambda i: (0, i)),  # N-tiled weight
                pl.BlockSpec((1, tn), lambda i: (0, i)),      # N-tiled bias
            ],
            out_specs=pl.BlockSpec((B, tn), lambda i: (0, i)),
        ),
        compiler_params=pltpu.CompilerParams(
            dimension_semantics=("parallel",)),  # shards N tiles across TCs (v7x)
        cost_estimate=cost,
    )(x_p, w_p, b_p)

    return out_padded[:, :E].astype(x.dtype)


def reference_forward_f32(x, w_t, b):
    return jnp.maximum(x @ w_t + b, 0.0)


def reference_forward_bf16(x, w_t, b):
    # Same precision recipe as the kernel: bf16 inputs, f32 accumulate/bias.
    y = jnp.dot(x.astype(jnp.bfloat16), w_t.astype(jnp.bfloat16),
                preferred_element_type=jnp.float32)
    return jnp.maximum(y + b.astype(jnp.float32), 0.0)


if __name__ == "__main__":
    in_features = 300
    embedding_size = 1000
    batch = 8

    key = jax.random.PRNGKey(0)
    k_x, k_w, k_b = jax.random.split(key, 3)

    # Deterministic parameter init mimicking torch.nn.Linear default:
    # U(-1/sqrt(fan_in), 1/sqrt(fan_in)).
    bound = 1.0 / jnp.sqrt(jnp.float32(in_features))
    # PyTorch Linear weight is [out, in]; store transposed [in, out] for the kernel.
    w = jax.random.uniform(k_w, (embedding_size, in_features),
                           dtype=jnp.float32, minval=-bound, maxval=bound)
    w_t = jnp.transpose(w)                               # [300, 1000]
    b = jax.random.uniform(k_b, (1, embedding_size),
                           dtype=jnp.float32, minval=-bound, maxval=bound)

    x = jax.random.normal(k_x, (batch, in_features), dtype=jnp.float32)

    out = text_encoder_forward(x, w_t, b)
    out = jax.block_until_ready(out)
    assert out.shape == (batch, embedding_size)

    # Tight check vs. a reference using the same bf16-input / f32-accumulate recipe.
    ref_bf16 = reference_forward_bf16(x, w_t, b)
    assert jnp.allclose(out, ref_bf16, atol=1e-5, rtol=1e-5)

    # Looser check vs. full-f32 reference (bf16 weight quantization error).
    ref_f32 = reference_forward_f32(x, w_t, b)
    assert jnp.allclose(out, ref_f32, atol=5e-2, rtol=5e-2)

    print("KERNEL_OK")
</pallas_src>

<mosaic_0001>
module attributes {stable_mosaic.version = 11 : i64} {
  func.func @text_encoder_kernel(%arg0: i32, %arg1: memref<8x384xbf16, #tpu.memory_space<vmem>>, %arg2: memref<384x512xbf16, #tpu.memory_space<vmem>>, %arg3: memref<1x512xf32, #tpu.memory_space<vmem>>, %arg4: memref<8x512xf32, #tpu.memory_space<vmem>>) attributes {dimension_semantics = [#tpu.dimension_semantics<parallel>], iteration_bounds = array<i64: 2>, scalar_prefetch = 0 : i64, scratch_operands = 0 : i64, tpu.core_type = #tpu.core_type<tc>, window_params = [{pipeline_mode = #tpu.pipeline_mode<synchronous>, transform_indices = @transform_0, window_bounds = array<i64: 8, 384>}, {transform_indices = @transform_1, window_bounds = array<i64: 384, 512>}, {transform_indices = @transform_2, window_bounds = array<i64: 1, 512>}, {transform_indices = @transform_3, window_bounds = array<i64: 8, 512>}]} {
    %c0 = arith.constant 0 : index
    %c0_0 = arith.constant 0 : index
    %0 = vector.load %arg1[%c0, %c0_0] : memref<8x384xbf16, #tpu.memory_space<vmem>>, vector<8x384xbf16>
    %c0_1 = arith.constant 0 : index
    %c0_2 = arith.constant 0 : index
    %1 = vector.load %arg2[%c0_1, %c0_2] : memref<384x512xbf16, #tpu.memory_space<vmem>>, vector<384x512xbf16>
    %cst = arith.constant dense<0.000000e+00> : vector<8x512xf32>
    %2 = tpu.matmul %0, %1, %cst {dimension_numbers = #tpu.dot_dimension_numbers<[1], [0], [0], [1], [0, 0, 1, 1], [], []>} : vector<8x384xbf16>, vector<384x512xbf16>, vector<8x512xf32> -> vector<8x512xf32>
    %c0_3 = arith.constant 0 : index
    %c0_4 = arith.constant 0 : index
    %3 = vector.load %arg3[%c0_3, %c0_4] : memref<1x512xf32, #tpu.memory_space<vmem>>, vector<1x512xf32>
    %4 = vector.broadcast %3 : vector<1x512xf32> to vector<8x512xf32>
    %5 = arith.addf %2, %4 : vector<8x512xf32>
    %cst_5 = arith.constant 0.000000e+00 : f32
    %6 = vector.broadcast %cst_5 : f32 to vector<8x512xf32>
    %7 = arith.maximumf %5, %6 : vector<8x512xf32>
    %c0_6 = arith.constant 0 : index
    %c0_7 = arith.constant 0 : index
    %8 = vector.load %arg4[%c0_6, %c0_7] : memref<8x512xf32, #tpu.memory_space<vmem>>, vector<8x512xf32>
    tpu.vector_store %arg4[%c0_6, %c0_7], %7 {strides = array<i32>} : memref<8x512xf32, #tpu.memory_space<vmem>>, vector<8x512xf32>,
    return
  }
  func.func @transform_0(%arg0: i32) -> (i32, i32) {
    %c0_i32 = arith.constant 0 : i32
    %c0_i32_0 = arith.constant 0 : i32
    %c0_i32_1 = arith.constant 0 : i32
    return %c0_i32, %c0_i32_0 : i32, i32
  }
  func.func @transform_1(%arg0: i32) -> (i32, i32) {
    %c0_i32 = arith.constant 0 : i32
    %c0_i32_0 = arith.constant 0 : i32
    return %c0_i32, %arg0 : i32, i32
  }
  func.func @transform_2(%arg0: i32) -> (i32, i32) {
    %c0_i32 = arith.constant 0 : i32
    %c0_i32_0 = arith.constant 0 : i32
    return %c0_i32, %arg0 : i32, i32
  }
  func.func @transform_3(%arg0: i32) -> (i32, i32) {
    %c0_i32 = arith.constant 0 : i32
    %c0_i32_0 = arith.constant 0 : i32
    return %c0_i32, %arg0 : i32, i32
  }
}

</mosaic_0001>

<bundles_post_ra>
// kernel: tpu_custom_call.1
= control target key start
LH: loop header
LB: loop body
LE: loop exit
PB: predicated region body
PF: predicated region fallthrough
CT: control target
= control target key end

     0   :  { %8 = vsyncpa [#allocation3], 0  ;;  %s1967_s0 = inlined_call_operand.hbm [shape: bf16[8,384], index: 0, kind: input, shape index: {}]   ;;  %s1968_s1 = inlined_call_operand.hbm [shape: bf16[384,1024], index: 1, kind: input, shape index: {}]   ;;  %s1969_s2 = inlined_call_operand.hbm [shape: f32[1,1024], index: 2, kind: input, shape index: {}]   ;;  %s1970_s3 = inlined_call_operand.hbm [shape: f32[8,1024], index: 3, kind: output, shape index: {}]  }
   0x1   :  { %9 = vsyncpa [#allocation6], 0 }
   0x2   :  { %11 = vsyncpa [#allocation6 + $0x1], 0 }
   0x3   :  { %12 = vsyncpa [#allocation4], 0 }
   0x4   :  { %14 = vsyncpa [#allocation4 + $0x1], 0  ;;  %s1656_s12 = smov 0   ;;  %s1658_s13 = smov 0  }
   0x5   :  { %s1660_s14 = smov 0   ;;  %s1662_s15 = smov 0  }
   0x6 LB: > { %s1677_s16 = sadd.s32 1, %s1626_s15   ;;  %s48_s17 = sadd.s32 1, %s1622_s14  ;;  %s1626_s15 = sphi %s1662_s15, %s1990_s15   ;;  %s1622_s14 = sphi %s1660_s14, %s1989_s14   ;;  %s1618_s13 = sphi %s1658_s13, %s1988_s13   ;;  %s1614_s12 = sphi %s1656_s12, %s1987_s12  }
   0x7   : > { %s45_s18 = ssub.s32 %s1626_s15, %s1677_s16  ;;  %p55_p0 = scmp.ne.s32.totalorder %s1622_s14, %s1618_s13 }
   0x8   : > { %p46_p1 = scmp.eq.s32.totalorder %s45_s18, 0  ;;  %p56_p2 = scmp.eq.s32.totalorder %s1626_s15, 0 }
   0x9   : > { %p1289_p4 = scmp.lt.s32.totalorder %s1626_s15, 2  ;;  %s148_s20 = sand.u32 1, %s1626_s15  }
   0xa   : > { %s1688_s19 = scalar_select %p46_p1, %s1622_s14, %s48_s17  }
   0xb   : > { %p57_p5 = por %p56_p2, %p55_p0  ;;  %s150_s21 = sand.u32 1, %s1622_s14  }
   0xc   : > { %s1261_s22 = smul.u32 768, %s150_s21  ;;  %s1258_s23 = sshll.u32 %s1626_s15, 8 }
   0xd   : > { %s1701_s26 = scalar_lea.hbm %s1968_s1, %s1258_s23  ;;  %p1703_p6 = pnand %p1289_p4, %p57_p5 }
   0xe   : > { %s152_s28 = scalar_lea.vmem [#allocation5], %s1261_s22  ;;  %s1709_s30 = scalar_lea.sflag [#allocation6], %s148_s20 }
   0xf   : > { %s159_s29 = sshll.u32 %s152_s28, 4  ;;  %s1476_s4 = scalar_lea.hbm %s1701_s26, 12288  ;;  %s1707_s29 = int_to_ptr.vmem [resolvable:$true] %s159_s29 }
  0x10   : > { %p1477_p7 = scmp.ne.s32.totalorder %s1701_s26, %s1476_s4  ;;  %p1971_p8 = pneg %p1703_p6 }
  0x11   : > { %s1481_s7 = scalar_lea.hbm %s1968_s1, 24576  ;;  %p1482_p11 = scmp.lt.s32.totalorder %s1701_s26, %s1968_s1 }
  0x12   : > { %p1479_p9 = pnand %p1971_p8, %p1477_p7  ;;  %p1483_p12 = scmp.lt.s32.totalorder %s1481_s7, %s1476_s4 }
  0x14   : > { %p1480_p10 = pneg %p1479_p9  ;;  %p1484_p13 = por %p1483_p12, %p1482_p11 }
  0x16   : > { %p1485_p1 = pnand %p1484_p13, %p1480_p10 }
  0x18   : > { %1488 = shalt.err (!%p1485_p1)
}
  0x19   : > { %s1489_s10 = scalar_lea.vmem %s1707_s29, 12288  ;;  %s1628_s11 = smov [#allocation5]  }
  0x1a   : > { %p1490_p2 = scmp.ne.s32.totalorder %s1707_s29, %s1489_s10  ;;  %s1494_s17 = sshll.u32 %s1628_s11, 4  ;;  %s1495_s17 = int_to_ptr.vmem [resolvable:$false] %s1494_s17 }
  0x1b   : > { %s1496_s18 = scalar_lea.vmem %s1495_s17, 24576  ;;  %p1497_p7 = scmp.lt.s32.totalorder %s1707_s29, %s1495_s17 }
  0x1c   : > { %p1492_p4 = pnand %p1490_p2, %p1971_p8  ;;  %p1498_p9 = scmp.lt.s32.totalorder %s1496_s18, %s1489_s10 }
  0x1e   : > { %p1493_p5 = pneg %p1492_p4  ;;  %p1499_p3 = por %p1498_p9, %p1497_p7 }
  0x20   : > { %p1500_p11 = pnand %p1499_p3, %p1493_p5 }
  0x22   : > { %1503 = shalt.err (!%p1500_p11)
}
  0x23   : > { %s1629_s20 = smov 512   ;;  %s1630_s22 = smov 256  }
  0x24   : > { %s1631_s23 = smov 16   ;;  %s1737_s24 = sadd.s32 4294967295, %s1626_s15  }
  0x25   : > { %1280 = dma.hbm_to_vmem [thread:$0]  (!%p1703_p6), %s1701_s26, 12288, %s1707_s29, %s1709_s30, %s1629_s20, %s1630_s22, %s1631_s23  }
  0x26   : > { %s1141_s25 = sadd.s32 4294967294, %s1626_s15   ;;  %p61_p3 = scmp.ne.s32.totalorder %s1618_s13, %s1614_s12 }
  0x27   : > { %p1973_p10 = scmp.eq.s32.totalorder %s1737_s24, 0  ;;  %p111_p12 = scmp.eq.s32.totalorder %s1737_s24, 1 }
  0x28   : > { %p117_p13 = scmp.eq.s32.totalorder %s1141_s25, 1  ;;  %p1142_p1 = scmp.ge.s32.totalorder %s1626_s15, 1 }
  0x29   : > { %p1747_p2 = por %p1973_p10, %p61_p3  ;;  %p1754_p4 = por %p111_p12, %p55_p0 }
  0x2a   : > { %p1758_p5 = por %p117_p13, %p61_p3  ;;  %p124_p7 = scmp.lt.s32.totalorder %s1626_s15, 3 }
  0x2b   : > { %s1976_s28 = scalar_select %p1747_p2, 1, 0 }
  0x2c   : > { %s1977_s26 = scalar_select %p1754_p4, 1, 0 }
  0x2d   : > { %s1978_s29 = scalar_select %p1758_p5, 1, 0 }
  0x2e   : > { %p1763_p9 = pnand %p1142_p1, %p124_p7  ;;  %s1632_s5 = smov [#allocation2]  }
  0x2f   : > { %s137_s6 = sshll.u32 %s1632_s5, 4  ;;  %s1147_s7 = sshll.u32 %s150_s21, 2  ;;  %s138_s6 = int_to_ptr.vmem [resolvable:$true] %s137_s6 }
  0x30   : > { %p1273_p11 = pneg %p1763_p9  ;;  %s1259_s8 = sshll.u32 %s1626_s15, 6 }
  0x31   : > { %s173_s9 = scalar_lea.vmem [#allocation7], %s1147_s7  ;;  %s1777_s18 = scalar_lea.hbm %s1969_s2, %s1259_s8 }
  0x32   : > { %s181_s10 = sshll.u32 %s173_s9, 4  ;;  %p1274_p0 = pnand %p1273_p11, %p1973_p10  ;;  %s1779_s10 = int_to_ptr.vmem [resolvable:$true] %s181_s10 }
  0x33   : > { %s1515_s20 = scalar_lea.vmem %s138_s6, 192  ;;  %p1523_p7 = scmp.lt.s32.totalorder %s138_s6, %s138_s6 }
  0x34   : > { %p1506_p3 = pneg %p1274_p0  ;;  %p1516_p12 = scmp.ne.s32.totalorder %s138_s6, %s1515_s20 }
  0x35   : > { %p1524_p8 = scmp.lt.s32.totalorder %s1515_s20, %s1515_s20 }
  0x36   : > { %p1518_p13 = pnand %p1516_p12, %p1506_p3 }
  0x37   : > { %p1525_p5 = por %p1524_p8, %p1523_p7 }
  0x38   : > { %p1519_p1 = pneg %p1518_p13 }
  0x3a   : > { %p1526_p4 = pnand %p1525_p5, %p1519_p1 }
  0x3c   : > { %1529 = shalt.err (!%p1526_p4)
}
  0x3d   : > { %1276 = dma.hbm_to_vmem [thread:$0]  (!%p1274_p0), %s1967_s0, 192, %s138_s6, [#allocation3]  }
  0x3e   : > { %s1530_s23 = scalar_lea.hbm %s1777_s18, 64  ;;  %p1980_p10 = pneg %p1703_p6 }
  0x3f   : > { %p1531_p11 = scmp.ne.s32.totalorder %s1777_s18, %s1530_s23  ;;  %s1535_s7 = scalar_lea.hbm %s1969_s2, 128 }
  0x40   : > { %p1536_p8 = scmp.lt.s32.totalorder %s1777_s18, %s1969_s2  ;;  %p1537_p4 = scmp.lt.s32.totalorder %s1535_s7, %s1530_s23 }
  0x41   : > { %p1533_p2 = pnand %p1531_p11, %p1980_p10 }
  0x42   : > { %p1538_p5 = por %p1537_p4, %p1536_p8 }
  0x43   : > { %p1534_p3 = pneg %p1533_p2 }
  0x45   : > { %p1539_p12 = pnand %p1538_p5, %p1534_p3 }
  0x47   : > { %1542 = shalt.err (!%p1539_p12)
}
  0x48   : > { %s1543_s6 = scalar_lea.vmem %s1779_s10, 64  ;;  %s1633_s11 = smov [#allocation7]  }
  0x49   : > { %p1544_p0 = scmp.ne.s32.totalorder %s1779_s10, %s1543_s6  ;;  %s1548_s17 = sshll.u32 %s1633_s11, 4  ;;  %s1549_s17 = int_to_ptr.vmem [resolvable:$false] %s1548_s17 }
  0x4a   : > { %s1550_s20 = scalar_lea.vmem %s1549_s17, 128  ;;  %p1551_p1 = scmp.lt.s32.totalorder %s1779_s10, %s1549_s17 }
  0x4b   : > { %p1546_p2 = pnand %p1544_p0, %p1980_p10  ;;  %p1552_p7 = scmp.lt.s32.totalorder %s1550_s20, %s1543_s6 }
  0x4d   : > { %p1547_p13 = pneg %p1546_p2  ;;  %p1553_p11 = por %p1552_p7, %p1551_p1 }
  0x4f   : > { %p1554_p8 = pnand %p1553_p11, %p1547_p13 }
  0x51   : > { %1557 = shalt.err (!%p1554_p8)
}
  0x52   : > { %1283 = dma.hbm_to_vmem [thread:$0]  (!%p1703_p6), %s1777_s18, 64, %s1779_s10, %s1709_s30  }
  0x53   : > { %190 = sbr.rel (%p1763_p9) target bundleno = 406 (0x196), region = 32  ;;  %p1981_p3 = scmp.eq.s32.totalorder (!%p1763_p9), %s1737_s24, 0 }
  0x58   : > { %1601 = dma.done.wait (%p1981_p3), [#allocation3], 192   ;;  %p1982_p4 = pmov %p1981_p3 }
  0x59   : > { %s196_s21 = sand.u32 1, %s1737_s24   ;;  %s1815_s22 = sand.u32 1, %s1618_s13  }
  0x5a   : > { %1603 = vsyncadd (%p1982_p4), [#allocation3], 4294967104  ;;  %s1262_s27 = smul.u32 768, %s1815_s22  ;;  %s197_s23 = scalar_lea.sflag [#allocation6], %s196_s21 }
  0x5b   : > { %p1983_p6 = scmp.ne.s32.totalorder %s1976_s28, 0 }
  0x5c   : > { %s1818_s25 = scalar_lea.vmem [#allocation5], %s1262_s27 }
  0x5d   : > { %1605 = dma.done.wait (%p1983_p6), %s197_s23, 12352  }
  0x5e   : > { %1607 = vsyncadd (%p1983_p6), %s197_s23, 4294954944  ;;  %v1634_v0 = vmov 0   ;;  %v1329_v1 = vld [vmem:[%s1818_s25 + $0xe4] ss:$16 sps:$4 sm:$0xff]   ;;  %v1333_v3 = vld [vmem:[%s1818_s25 + $0xe0] ss:$16 sps:$4 sm:$0xff]  }
  0x5f   : > { %925 = vmatprep.mubr.bf16.mxu1 %v1634_v0  ;;  %v1331_v2 = vld [vmem:[%s1818_s25 + $0x2e4] ss:$16 sps:$4 sm:$0xff]   ;;  %852 = vmatprep.subr.bf16.mxu0 %v1329_v1  ;;  %v1334_v4 = vld [vmem:[%s1818_s25 + $0x2e0] ss:$16 sps:$4 sm:$0xff]   ;;  %v1382_v34 = vld [vmem:[%s1818_s25 + $0xec] ss:$16 sps:$4 sm:$0xff]  }
  0x60   : > { %893 = vmatprep.subr.bf16.mxu1 %v1331_v2  ;;  %v1335_v5 = vld [vmem:[%s1818_s25 + $0xc4] ss:$16 sps:$4 sm:$0xff]   ;;  %853 = vmatpush1.bf16.msra.mxu0 %v1333_v3  ;;  %v1339_v7 = vld [vmem:[%s1818_s25 + $0xc0] ss:$16 sps:$4 sm:$0xff]   ;;  %v1859_v35 = vld [vmem:[#allocation2 + $0x8] ss:$0 sps:$4 sm:$0xff]  }
  0x61   : > { %894 = vmatpush1.bf16.msra.mxu1 %v1334_v4  ;;  %v1337_v6 = vld [vmem:[%s1818_s25 + $0x2c4] ss:$16 sps:$4 sm:$0xff]   ;;  %854 = vmatprep.subr.bf16.mxu0 %v1335_v5  ;;  %v1340_v8 = vld [vmem:[%s1818_s25 + $0x2c0] ss:$16 sps:$4 sm:$0xff]   ;;  %v1380_v36 = vld [vmem:[%s1818_s25 + $0xe8] ss:$16 sps:$4 sm:$0xff]  }
  0x62   : > { %895 = vmatprep.subr.bf16.mxu1 %v1337_v6  ;;  %v1341_v9 = vld [vmem:[%s1818_s25 + $0xa4] ss:$16 sps:$4 sm:$0xff]   ;;  %v1345_v11 = vld [vmem:[%s1818_s25 + $0xa0] ss:$16 sps:$4 sm:$0xff]   ;;  %v1388_v39 = vld [vmem:[%s1818_s25 + $0xcc] ss:$16 sps:$4 sm:$0xff]  }
  0x63   : > { %v1343_v10 = vld [vmem:[%s1818_s25 + $0x2a4] ss:$16 sps:$4 sm:$0xff]   ;;  %v1346_v12 = vld [vmem:[%s1818_s25 + $0x2a0] ss:$16 sps:$4 sm:$0xff]   ;;  %v1386_v40 = vld [vmem:[%s1818_s25 + $0xc8] ss:$16 sps:$4 sm:$0xff]  }
  0x64   : > { %855 = vmatpush1.bf16.msra.mxu0 %v1339_v7  ;;  %v1347_v13 = vld [vmem:[%s1818_s25 + $0x84] ss:$16 sps:$4 sm:$0xff]   ;;  %v1351_v15 = vld [vmem:[%s1818_s25 + $0x80] ss:$16 sps:$4 sm:$0xff]   ;;  %v1394_v43 = vld [vmem:[%s1818_s25 + $0xac] ss:$16 sps:$4 sm:$0xff]  }
  0x65   : > { %896 = vmatpush1.bf16.msra.mxu1 %v1340_v8  ;;  %856 = vmatprep.subr.bf16.mxu0 %v1341_v9  ;;  %v1349_v14 = vld [vmem:[%s1818_s25 + $0x284] ss:$16 sps:$4 sm:$0xff]   ;;  %v1352_v16 = vld [vmem:[%s1818_s25 + $0x280] ss:$16 sps:$4 sm:$0xff]   ;;  %v1392_v44 = vld [vmem:[%s1818_s25 + $0xa8] ss:$16 sps:$4 sm:$0xff]  }
  0x66   : > { %897 = vmatprep.subr.bf16.mxu1 %v1343_v10  ;;  %v1353_v17 = vld [vmem:[%s1818_s25 + $0x64] ss:$16 sps:$4 sm:$0xff]   ;;  %v1357_v19 = vld [vmem:[%s1818_s25 + $0x60] ss:$16 sps:$4 sm:$0xff]   ;;  %v1400_v47 = vld [vmem:[%s1818_s25 + $0x8c] ss:$16 sps:$4 sm:$0xff]  }
  0x67   : > { %v1355_v18 = vld [vmem:[%s1818_s25 + $0x264] ss:$16 sps:$4 sm:$0xff]   ;;  %v1358_v20 = vld [vmem:[%s1818_s25 + $0x260] ss:$16 sps:$4 sm:$0xff]   ;;  %v1398_v48 = vld [vmem:[%s1818_s25 + $0x88] ss:$16 sps:$4 sm:$0xff]  }
  0x68   : > { %857 = vmatpush1.bf16.msra.mxu0 %v1345_v11  ;;  %v1359_v21 = vld [vmem:[%s1818_s25 + $0x44] ss:$16 sps:$4 sm:$0xff]   ;;  %v1363_v23 = vld [vmem:[%s1818_s25 + $0x40] ss:$16 sps:$4 sm:$0xff]   ;;  %v1406_v53 = vld [vmem:[%s1818_s25 + $0x6c] ss:$16 sps:$4 sm:$0xff]  }
  0x69   : > { %898 = vmatpush1.bf16.msra.mxu1 %v1346_v12  ;;  %858 = vmatprep.subr.bf16.mxu0 %v1347_v13  ;;  %v1361_v22 = vld [vmem:[%s1818_s25 + $0x244] ss:$16 sps:$4 sm:$0xff]   ;;  %v1364_v24 = vld [vmem:[%s1818_s25 + $0x240] ss:$16 sps:$4 sm:$0xff]   ;;  %v1404_v54 = vld [vmem:[%s1818_s25 + $0x68] ss:$16 sps:$4 sm:$0xff]  }
  0x6a   : > { %899 = vmatprep.subr.bf16.mxu1 %v1349_v14  ;;  %v1365_v25 = vld [vmem:[%s1818_s25 + $0x24] ss:$16 sps:$4 sm:$0xff]   ;;  %v1369_v27 = vld [vmem:[%s1818_s25 + $0x20] ss:$16 sps:$4 sm:$0xff]   ;;  %v1412_v57 = vld [vmem:[%s1818_s25 + $0x4c] ss:$16 sps:$4 sm:$0xff]  }
  0x6b   : > { %v1367_v26 = vld [vmem:[%s1818_s25 + $0x224] ss:$16 sps:$4 sm:$0xff]   ;;  %v1370_v28 = vld [vmem:[%s1818_s25 + $0x220] ss:$16 sps:$4 sm:$0xff]   ;;  %v1410_v58 = vld [vmem:[%s1818_s25 + $0x48] ss:$16 sps:$4 sm:$0xff]  }
  0x6c   : > { %859 = vmatpush1.bf16.msra.mxu0 %v1351_v15  ;;  %v1371_v29 = vld [vmem:[%s1818_s25 + $0x4] ss:$16 sps:$4 sm:$0xff]   ;;  %v1375_v31 = vld [vmem:[%s1818_s25] ss:$16 sps:$4 sm:$0xff]   ;;  %v1418_v61 = vld [vmem:[%s1818_s25 + $0x2c] ss:$16 sps:$4 sm:$0xff]  }
  0x6d   : > { %900 = vmatpush1.bf16.msra.mxu1 %v1352_v16  ;;  %860 = vmatprep.subr.bf16.mxu0 %v1353_v17  ;;  %v1373_v30 = vld [vmem:[%s1818_s25 + $0x204] ss:$16 sps:$4 sm:$0xff]   ;;  %v1376_v32 = vld [vmem:[%s1818_s25 + $0x200] ss:$16 sps:$4 sm:$0xff]   ;;  %v1416_v62 = vld [vmem:[%s1818_s25 + $0x28] ss:$16 sps:$4 sm:$0xff]  }
  0x6e   : > { %901 = vmatprep.subr.bf16.mxu1 %v1355_v18  ;;  %v1377_v33 = vld [vmem:[%s1818_s25 + $0x1e4] ss:$16 sps:$4 sm:$0xff]   ;;  %v1383_v37 = vld [vmem:[%s1818_s25 + $0x1e0] ss:$16 sps:$4 sm:$0xff]   ;;  %v1424_v2 = vld [vmem:[%s1818_s25 + $0xc] ss:$16 sps:$4 sm:$0xff]  }
  0x6f   : > { %v1384_v38 = vld [vmem:[%s1818_s25 + $0x1c4] ss:$16 sps:$4 sm:$0xff]   ;;  %v1389_v41 = vld [vmem:[%s1818_s25 + $0x1c0] ss:$16 sps:$4 sm:$0xff]   ;;  %v1422_v3 = vld [vmem:[%s1818_s25 + $0x8] ss:$16 sps:$4 sm:$0xff]  }
  0x70   : > { %861 = vmatpush1.bf16.msra.mxu0 %v1357_v19  ;;  %v1390_v42 = vld [vmem:[%s1818_s25 + $0x1a4] ss:$16 sps:$4 sm:$0xff]   ;;  %v1395_v45 = vld [vmem:[%s1818_s25 + $0x1a0] ss:$16 sps:$4 sm:$0xff]   ;;  %v1430_v5 = vld [vmem:[%s1818_s25 + $0x1ec] ss:$16 sps:$4 sm:$0xff]  }
  0x71   : > { %902 = vmatpush1.bf16.msra.mxu1 %v1358_v20  ;;  %862 = vmatprep.subr.bf16.mxu0 %v1359_v21  ;;  %v1396_v46 = vld [vmem:[%s1818_s25 + $0x184] ss:$16 sps:$4 sm:$0xff]   ;;  %v1401_v50 = vld [vmem:[%s1818_s25 + $0x180] ss:$16 sps:$4 sm:$0xff]   ;;  %v1433_v6 = vld [vmem:[%s1818_s25 + $0x2ec] ss:$16 sps:$4 sm:$0xff]  }
  0x72   : > { %903 = vmatprep.subr.bf16.mxu1 %v1361_v22  ;;  %v241_v49 = vld [vmem:[#allocation2] sm:$0xff]  ;;  %v1407_v55 = vld [vmem:[%s1818_s25 + $0x160] ss:$16 sps:$4 sm:$0xff]   ;;  %v1436_v10 = vld [vmem:[%s1818_s25 + $0x1cc] ss:$16 sps:$4 sm:$0xff]   ;;  %s1152_s30 = sshll.u32 %s1815_s22, 2 }
  0x73   : > { %v1402_v51 = vld [vmem:[%s1818_s25 + $0x164] ss:$16 sps:$4 sm:$0xff]   ;;  %v1155_v52 = vcombine.high %v241_v49, %v241_v49  ;;  %v1413_v59 = vld [vmem:[%s1818_s25 + $0x140] ss:$16 sps:$4 sm:$0xff]   ;;  %v1894_v7 = vcombine.low %v241_v49, %v241_v49  ;;  %v1428_v8 = vld [vmem:[%s1818_s25 + $0x1e8] ss:$16 sps:$4 sm:$0xff]  }
  0x74   : > { %863 = vmatpush1.bf16.msra.mxu0 %v1363_v23  ;;  %v1408_v56 = vld [vmem:[%s1818_s25 + $0x144] ss:$16 sps:$4 sm:$0xff]   ;;  %v1419_v63 = vld [vmem:[%s1818_s25 + $0x120] ss:$16 sps:$4 sm:$0xff]   ;;  %v1431_v9 = vld [vmem:[%s1818_s25 + $0x2e8] ss:$16 sps:$4 sm:$0xff]  }
  0x75   : > { %904 = vmatpush1.bf16.msra.mxu1 %v1364_v24  ;;  %864 = vmatprep.subr.bf16.mxu0 %v1365_v25  ;;  %v1414_v60 = vld [vmem:[%s1818_s25 + $0x124] ss:$16 sps:$4 sm:$0xff]   ;;  %v1425_v4 = vld [vmem:[%s1818_s25 + $0x100] ss:$16 sps:$4 sm:$0xff]   ;;  %v1439_v11 = vld [vmem:[%s1818_s25 + $0x2cc] ss:$16 sps:$4 sm:$0xff]  }
  0x76   : > { %905 = vmatprep.subr.bf16.mxu1 %v1367_v26  ;;  %884 = vmatprep.mubr.bf16.mxu0 %v1155_v52  ;;  %v1420_v1 = vld [vmem:[%s1818_s25 + $0x104] ss:$16 sps:$4 sm:$0xff]   ;;  %v1434_v12 = vld [vmem:[%s1818_s25 + $0x1c8] ss:$16 sps:$4 sm:$0xff]   ;;  %v1442_v14 = vld [vmem:[%s1818_s25 + $0x1ac] ss:$16 sps:$4 sm:$0xff]  }
  0x77   : > { %v1437_v13 = vld [vmem:[%s1818_s25 + $0x2c8] ss:$16 sps:$4 sm:$0xff]   ;;  %v1445_v15 = vld [vmem:[%s1818_s25 + $0x2ac] ss:$16 sps:$4 sm:$0xff]   ;;  %s209_s28 = scalar_lea.vmem [#allocation7], %s1152_s30  ;;  %s1153_s4 = sshll.u32 %s1815_s22, 5 }
  0x78   : > { %865 = vmatpush1.bf16.msra.mxu0 %v1369_v27  ;;  %v1440_v16 = vld [vmem:[%s1818_s25 + $0x1a8] ss:$16 sps:$4 sm:$0xff]   ;;  %v1448_v18 = vld [vmem:[%s1818_s25 + $0x18c] ss:$16 sps:$4 sm:$0xff]   ;;  %s236_s10 = scalar_lea.vmem [#allocation8], %s1153_s4  ;;  %s1260_s18 = sshll.u32 %s1737_s24, 9 }
  0x79   : > { %906 = vmatpush1.bf16.msra.mxu1 %v1370_v28  ;;  %866 = vmatprep.subr.bf16.mxu0 %v1371_v29  ;;  %v1443_v17 = vld [vmem:[%s1818_s25 + $0x2a8] ss:$16 sps:$4 sm:$0xff]   ;;  %v1451_v19 = vld [vmem:[%s1818_s25 + $0x28c] ss:$16 sps:$4 sm:$0xff]   ;;  %s1039_s5 = sshll.u32 %s236_s10, 4  ;;  %s1037_s9 = scalar_lea.hbm %s1970_s3, %s1260_s18  ;;  %s1040_s5 = int_to_ptr.vmem [resolvable:$true] %s1039_s5 }
  0x7a   : > { %907 = vmatprep.subr.bf16.mxu1 %v1373_v30  ;;  %v1446_v20 = vld [vmem:[%s1818_s25 + $0x188] ss:$16 sps:$4 sm:$0xff]   ;;  %v1457_v22 = vld [vmem:[%s1818_s25 + $0x26c] ss:$16 sps:$4 sm:$0xff]   ;;  %s1025_s6 = scalar_lea.sflag [#allocation4], %s1815_s22  ;;  %s1558_s11 = scalar_lea.vmem %s1040_s5, 512 }
  0x7b   : > { %v1449_v21 = vld [vmem:[%s1818_s25 + $0x288] ss:$16 sps:$4 sm:$0xff]   ;;  %v1460_v25 = vld [vmem:[%s1818_s25 + $0x14c] ss:$16 sps:$4 sm:$0xff]   ;;  %p1559_p9 = scmp.ne.s32.totalorder %s1040_s5, %s1558_s11  ;;  %p1984_p5 = scmp.ne.s32.totalorder %s1977_s26, 0 }
  0x7c   : > { %867 = vmatpush1.bf16.msra.mxu0 %v1375_v31  ;;  %v1452_v23 = vld [vmem:[%s1818_s25 + $0x168] ss:$16 sps:$4 sm:$0xff]   ;;  %v1463_v26 = vld [vmem:[%s1818_s25 + $0x24c] ss:$16 sps:$4 sm:$0xff]   ;;  %s1635_s24 = smov [#allocation8]  }
  0x7d   : > { %908 = vmatpush1.bf16.msra.mxu1 %v1376_v32  ;;  %868 = vmatprep.subr.bf16.mxu0 %v1377_v33  ;;  %v1455_v24 = vld [vmem:[%s1818_s25 + $0x268] ss:$16 sps:$4 sm:$0xff]   ;;  %v1466_v29 = vld [vmem:[%s1818_s25 + $0x12c] ss:$16 sps:$4 sm:$0xff]   ;;  %p1560_p12 = pnand %p1559_p9, %p1984_p5  ;;  %s1562_s17 = sshll.u32 %s1635_s24, 4  ;;  %s1563_s17 = int_to_ptr.vmem [resolvable:$false] %s1562_s17 }
  0x7e   : > { %934 = vmatprep.subr.bf16.mxu1 %v1382_v34  ;;  %v1458_v27 = vld [vmem:[%s1818_s25 + $0x148] ss:$16 sps:$4 sm:$0xff]   ;;  %v1469_v30 = vld [vmem:[%s1818_s25 + $0x22c] ss:$16 sps:$4 sm:$0xff]   ;;  %s1564_s20 = scalar_lea.vmem %s1563_s17, 1024  ;;  %p1565_p10 = scmp.lt.s32.totalorder %s1040_s5, %s1563_s17 }
  0x7f   : > { %v1461_v28 = vld [vmem:[%s1818_s25 + $0x248] ss:$16 sps:$4 sm:$0xff]   ;;  %v1472_v33 = vld [vmem:[%s1818_s25 + $0x10c] ss:$16 sps:$4 sm:$0xff]   ;;  %p1561_p0 = pneg %p1560_p12  ;;  %p1566_p2 = scmp.lt.s32.totalorder %s1564_s20, %s1558_s11 }
  0x80   : > { %926 = vmatmul.mubr.bf16.vlgmr.msra.gmra.mxu1 %v1859_v35  ;;  %869 = vmatpush2.bf16.msra.mxu0 %v1383_v37  ;;  %v1464_v31 = vld [vmem:[%s1818_s25 + $0x128] ss:$16 sps:$4 sm:$0xff]   ;;  %v1475_v34 = vld [vmem:[%s1818_s25 + $0x20c] ss:$16 sps:$4 sm:$0xff]  }
  0x81   : > { %935 = vmatpush1.bf16.msra.mxu1 %v1380_v36  ;;  %870 = vmatprep.subr.bf16.mxu0 %v1384_v38  ;;  %v1467_v32 = vld [vmem:[%s1818_s25 + $0x228] ss:$16 sps:$4 sm:$0xff]   ;;  %p1567_p13 = por %p1566_p2, %p1565_p10 }
  0x82   : > { %936 = vmatprep.subr.bf16.mxu1 %v1388_v39  ;;  %966 = vmatprep.mubr.bf16.mxu1 %v1155_v52  ;;  %v1470_v36 = vld [vmem:[%s1818_s25 + $0x108] ss:$16 sps:$4 sm:$0xff]  }
  0x83   : > { %v1473_v37 = vld [vmem:[%s1818_s25 + $0x208] ss:$16 sps:$4 sm:$0xff]   ;;  %p1568_p1 = pnand %p1567_p13, %p1561_p0 }
  0x84   : > { %871 = vmatpush2.bf16.msra.mxu0 %v1389_v41 }
  0x85   : > { %937 = vmatpush1.bf16.msra.mxu1 %v1386_v40  ;;  %872 = vmatprep.subr.bf16.mxu0 %v1390_v42  ;;  %v341_v42 = vlaneseq }
  0x86   : > { %938 = vmatprep.subr.bf16.mxu1 %v1394_v43 }
  0x87   : > { %v342_v43 = vshrl.u32 %v341_v42, 7 }
  0x88   : > { %873 = vmatpush2.bf16.msra.mxu0 %v1395_v45  ;;  %v339_v45 = vld [vmem:[%s209_s28] sm:$0xf] }
  0x89   : > { %939 = vmatpush1.bf16.msra.mxu1 %v1392_v44  ;;  %874 = vmatprep.subr.bf16.mxu0 %v1396_v46  ;;  %v343_v44 = vsub.s32 0, %v342_v43  ;;  %v347_v46 = vsub.s32 1, %v342_v43 }
  0x8a   : > { %940 = vmatprep.subr.bf16.mxu1 %v1400_v47 }
  0x8b   : > { %v344_v47 = vrot.slane %v339_v45, %v343_v44 }
  0x8c   : > { %875 = vmatpush2.bf16.msra.mxu0 %v1401_v50 }
  0x8d   : > { %941 = vmatpush1.bf16.msra.mxu1 %v1398_v48  ;;  %876 = vmatprep.subr.bf16.mxu0 %v1402_v51  ;;  %v348_v48 = vrot.slane %v339_v45, %v347_v46 }
  0x8e   : > { %942 = vmatprep.subr.bf16.mxu1 %v1406_v53 }
  0x90   : > { %877 = vmatpush2.bf16.msra.mxu0 %v1407_v55 }
  0x91   : > { %943 = vmatpush1.bf16.msra.mxu1 %v1404_v54  ;;  %878 = vmatprep.subr.bf16.mxu0 %v1408_v56 }
  0x92   : > { %944 = vmatprep.subr.bf16.mxu1 %v1412_v57 }
  0x94   : > { %879 = vmatpush2.bf16.msra.mxu0 %v1413_v59  ;;  %v355_v59 = vsub.s32 3, %v342_v43 }
  0x95   : > { %945 = vmatpush1.bf16.msra.mxu1 %v1410_v58  ;;  %880 = vmatprep.subr.bf16.mxu0 %v1414_v60  ;;  %v351_v58 = vsub.s32 2, %v342_v43 }
  0x96   : > { %946 = vmatprep.subr.bf16.mxu1 %v1418_v61  ;;  %v356_v61 = vrot.slane %v339_v45, %v355_v59 }
  0x97   : > { %v352_v60 = vrot.slane %v339_v45, %v351_v58 }
  0x98   : > { %881 = vmatpush2.bf16.msra.mxu0 %v1419_v63 }
  0x99   : > { %947 = vmatpush1.bf16.msra.mxu1 %v1416_v62  ;;  %882 = vmatprep.subr.bf16.mxu0 %v1420_v1 }
  0x9a   : > { %948 = vmatprep.subr.bf16.mxu1 %v1424_v2 }
  0x9c   : > { %883 = vmatpush2.bf16.msra.mxu0 %v1425_v4 }
  0x9d   : > { %949 = vmatpush1.bf16.msra.mxu1 %v1422_v3  ;;  %975 = vmatprep.subr.bf16.mxu0 %v1433_v6 }
  0x9e   : > { %950 = vmatprep.subr.bf16.mxu1 %v1430_v5 }
  0x9f   : > { %885 = vmatmul.mubr.bf16.vlgmr.msra.gmra.mxu0 %v1894_v7 }
  0xa0   : > { %976 = vmatpush1.bf16.msra.mxu0 %v1431_v9  ;;  %1007 = vmatprep.mubr.bf16.mxu0 %v1634_v0  ;;  %v1454_v0 = vld [vmem:[%s1818_s25 + $0x16c] ss:$16 sps:$4 sm:$0xff]  }
  0xa1   : > { %951 = vmatpush2.bf16.msra.mxu1 %v1428_v8  ;;  %977 = vmatprep.subr.bf16.mxu0 %v1439_v11 }
  0xa2   : > { %952 = vmatprep.subr.bf16.mxu1 %v1436_v10 }
  0xa4   : > { %978 = vmatpush1.bf16.msra.mxu0 %v1437_v13 }
  0xa5   : > { %953 = vmatpush2.bf16.msra.mxu1 %v1434_v12  ;;  %979 = vmatprep.subr.bf16.mxu0 %v1445_v15 }
  0xa6   : > { %954 = vmatprep.subr.bf16.mxu1 %v1442_v14 }
  0xa8   : > { %980 = vmatpush1.bf16.msra.mxu0 %v1443_v17 }
  0xa9   : > { %955 = vmatpush2.bf16.msra.mxu1 %v1440_v16  ;;  %981 = vmatprep.subr.bf16.mxu0 %v1451_v19 }
  0xaa   : > { %956 = vmatprep.subr.bf16.mxu1 %v1448_v18 }
  0xac   : > { %982 = vmatpush1.bf16.msra.mxu0 %v1449_v21 }
  0xad   : > { %957 = vmatpush2.bf16.msra.mxu1 %v1446_v20  ;;  %983 = vmatprep.subr.bf16.mxu0 %v1457_v22 }
  0xae   : > { %958 = vmatprep.subr.bf16.mxu1 %v1454_v0 }
  0xb0   : > { %984 = vmatpush1.bf16.msra.mxu0 %v1455_v24 }
  0xb1   : > { %959 = vmatpush2.bf16.msra.mxu1 %v1452_v23  ;;  %985 = vmatprep.subr.bf16.mxu0 %v1463_v26 }
  0xb2   : > { %960 = vmatprep.subr.bf16.mxu1 %v1460_v25 }
  0xb4   : > { %986 = vmatpush1.bf16.msra.mxu0 %v1461_v28 }
  0xb5   : > { %961 = vmatpush2.bf16.msra.mxu1 %v1458_v27  ;;  %987 = vmatprep.subr.bf16.mxu0 %v1469_v30 }
  0xb6   : > { %962 = vmatprep.subr.bf16.mxu1 %v1466_v29 }
  0xb8   : > { %988 = vmatpush1.bf16.msra.mxu0 %v1467_v32 }
  0xb9   : > { %963 = vmatpush2.bf16.msra.mxu1 %v1464_v31  ;;  %989 = vmatprep.subr.bf16.mxu0 %v1475_v34 }
  0xba   : > { %964 = vmatprep.subr.bf16.mxu1 %v1472_v33 }
  0xbc   : > { %990 = vmatpush1.bf16.msra.mxu0 %v1473_v37 }
  0xbd   : > { %965 = vmatpush2.bf16.msra.mxu1 %v1470_v36 }
  0xbf   : > { %1008 = vmatmul.mubr.bf16.vlgmr.msra.gmra.mxu0 %v1859_v35 }
  0xc0   : > { %967 = vmatmul.mubr.bf16.vlgmr.msra.gmra.mxu1 %v1894_v7 }
 0x140   : > { %v927_v38 = vpop.f32.mrf.mxu1 }
 0x142   : > { %v929_v39 = vpop.f32.mrf.mxu1 }
 0x144   : > { %v931_v40 = vpop.f32.mrf.mxu1 }
 0x146   : > { %v932_v41 = vpop.f32.mrf.mxu1 }
 0x15f   : > { %v886_v49 = vpop.f32.mrf.mxu0 }
 0x160   : > { %v887_v50 = vadd.f32 %v886_v49, %v344_v47 }
 0x161   : > { %v888_v51 = vpop.f32.mrf.mxu0 }
 0x162   : > { %v928_v52 = vadd.f32 %v927_v38, %v887_v50  ;;  %v889_v53 = vadd.f32 %v888_v51, %v348_v48 }
 0x163   : > { %v890_v35 = vpop.f32.mrf.mxu0 }
 0x164   : > { %v1016_v54 = vmax.f32 %v928_v52, 0.0  ;;  %v930_v55 = vadd.f32 %v929_v39, %v889_v53 }
 0x165   : > { %v891_v56 = vpop.f32.mrf.mxu0 }
 0x166   : > { %1020 = vst [vmem:[%s236_s10] sm:$0xff] %v1016_v54  ;;  %v1017_v57 = vmax.f32 %v930_v55, 0.0 }
 0x168   : > { %1021 = vst [vmem:[%s236_s10 + $0x8] sm:$0xff] %v1017_v57 }
 0x17f   : > { %v1009_v63 = vpop.f32.mrf.mxu0 }
 0x180   : > { %v968_v62 = vpop.f32.mrf.mxu1 }
 0x181   : > { %v969_v1 = vadd.f32 %v968_v62, %v352_v60  ;;  %v1011_v3 = vpop.f32.mrf.mxu0 }
 0x182   : > { %v970_v2 = vpop.f32.mrf.mxu1 }
 0x183   : > { %v1010_v4 = vadd.f32 %v1009_v63, %v969_v1  ;;  %v971_v5 = vadd.f32 %v970_v2, %v356_v61  ;;  %v1013_v7 = vpop.f32.mrf.mxu0 }
 0x184   : > { %v972_v6 = vpop.f32.mrf.mxu1 }
 0x185   : > { %v1018_v8 = vmax.f32 %v1010_v4, 0.0  ;;  %v1012_v9 = vadd.f32 %v1011_v3, %v971_v5  ;;  %v1014_v11 = vpop.f32.mrf.mxu0 }
 0x186   : > { %v973_v10 = vpop.f32.mrf.mxu1 }
 0x187   : > { %1022 = vst [vmem:[%s236_s10 + $0x10] sm:$0xff] %v1018_v8  ;;  %v1019_v12 = vmax.f32 %v1012_v9, 0.0 }
 0x189   : > { %1023 = vst [vmem:[%s236_s10 + $0x18] sm:$0xff] %v1019_v12 }
 0x18a   : > { %1571 = shalt.err (!%p1568_p1)
}
 0x18b   : > { %s1572_s21 = scalar_lea.hbm %s1037_s9, 512  ;;  %s1576_s23 = scalar_lea.hbm %s1970_s3, 1024 }
 0x18c   : > { %p1573_p7 = scmp.ne.s32.totalorder %s1037_s9, %s1572_s21  ;;  %p1577_p3 = scmp.lt.s32.totalorder %s1037_s9, %s1970_s3 }
 0x18d   : > { %p1578_p4 = scmp.lt.s32.totalorder %s1576_s23, %s1572_s21 }
 0x18e   : > { %p1574_p11 = pnand %p1573_p7, %p1984_p5 }
 0x18f   : > { %p1579_p6 = por %p1578_p4, %p1577_p3 }
 0x190   : > { %p1575_p8 = pneg %p1574_p11 }
 0x192   : > { %p1580_p9 = pnand %p1579_p6, %p1575_p8 }
 0x194   : > { %1583 = shalt.err (!%p1580_p9)
}
 0x195   : > { %1271 = dma.vmem_to_hbm [thread:$0]  (%p1984_p5), %s1040_s5, 512, %s1037_s9, %s1025_s6  }
 0x196 PF: > { %s1051_s28 = sand.u32 1, %s1614_s12   ;;  %p1985_p12 = scmp.ne.s32.totalorder %s1978_s29, 0 }
 0x197   : > { %p1986_p0 = scmp.ge.s32.totalorder %s1626_s15, 2  ;;  %s1052_s4 = scalar_lea.sflag [#allocation4], %s1051_s28 }
 0x199   : > { %p1285_p10 = pnand %p1986_p0, %p1985_p12 }
 0x19b   : > { %p1286_p2 = pneg %p1285_p10 }
 0x19d   : > { %1609 = dma.done.wait (%p1286_p2), %s1052_s4, 512  }
 0x19e   : > { %1611 = vsyncadd (%p1286_p2), %s1052_s4, 4294966784  ;;  %p17_p13 = scmp.ge.s32.totalorder %s1677_s16, 4   ;;  %s1987_s12 = smov %s1618_s13 }
 0x19f   : > { %s1988_s13 = smov %s1622_s14  ;;  %s1989_s14 = smov %s1688_s19 }
 0x1a0   : > { %s1990_s15 = smov %s1677_s16  ;;  %19 = sbr.rel (!%p17_p13) target bundleno = 6 (0x6), region = 93 }
 0x1a5   :  { %1057 = vsyncpa [#allocation3], 1 }
 0x1a6   :  { %1059 = vsyncpa [#allocation3 + $0x1], 1 }
 0x1a7   :  { %1060 = vsyncpa [#allocation6], 1 }
 0x1a8   :  { %1062 = vsyncpa [#allocation6 + $0x1], 1 }
 0x1a9   :  { %1063 = vsyncpa [#allocation4], 1 }
 0x1aa   :  { %1065 = vsyncpa [#allocation4 + $0x1], 1 }

</bundles_post_ra>
